<compile_context>
chip_gen: v7x
topology: tpu7x:2x2x1
jax: 0.10.0
libtpu: 0.0.40
codegen_flags: <defaults>
</compile_context>

<pallas_src>
import jax
import jax.numpy as jnp
from jax.experimental import pallas as pl
from jax.experimental.pallas import tpu as pltpu


def _inductive_offset_kernel(xs_ref, wpre_ref, wpost_ref, out_ref):
    bb, E = out_ref.shape            # (block_b, expand_dims)

    x = xs_ref[...]                  # (2*bb, 2E): rows [0:bb]=branch1, [bb:]=branch2
    w_pre = wpre_ref[...]            # (2E, M)
    w_post = wpost_ref[...]          # (M, E)

    # Single MXU matmul for both branches (stacked along the sublane/batch
    # axis), contraction depth K = 2E, f32 accumulation.
    t = jnp.dot(x, w_pre, preferred_element_type=jnp.float32)   # (2*bb, M) f32
    t = jnp.maximum(t, 0.0)                                     # relu
    combined = jnp.minimum(t[0:bb, :], t[bb:2 * bb, :])         # agg_func = min

    gate = jax.nn.sigmoid(
        jnp.dot(combined.astype(w_post.dtype), w_post,
                preferred_element_type=jnp.float32))            # (bb, E) f32

    # The offset halves of the concatenated rows are columns [E:2E].
    o1 = x[0:bb, E:2 * E].astype(jnp.float32)
    o2 = x[bb:2 * bb, E:2 * E].astype(jnp.float32)
    offset_min = jnp.minimum(o1, o2)

    out_ref[...] = (offset_min * gate).astype(out_ref.dtype)


def inductive_offset_set(e1, e1_o, e2, e2_o, w_pre, w_post, *,
                         block_b=512, compute_dtype=jnp.bfloat16):
    B, E = e1.shape
    twoE, M = w_pre.shape
    assert twoE == 2 * E and w_post.shape == (M, E)

    # ---- batch tiling: clamp the tile for small batches, zero-pad ragged ones.
    B_sub = ((B + 7) // 8) * 8                  # sublane-aligned batch
    bb = max(8, min(block_b, B_sub))
    bb = ((bb + 7) // 8) * 8                    # keep a multiple of 8
    n_blocks = pl.cdiv(B_sub, bb)               # >=2 steps for large B -> both v7x TCs
    B_pad = n_blocks * bb
    pad = B_pad - B

    def prep(a):
        a = a.astype(compute_dtype)
        if pad:
            a = jnp.pad(a, ((0, pad), (0, 0)))  # zero rows flow harmlessly
        return a

    # Wrapper-side concat (layout plumbing) + per-tile branch interleave:
    # each grid step sees one (2*bb, 2E) slab = [branch1 rows ; branch2 rows].
    x1 = prep(jnp.concatenate([e1, e1_o], axis=1))   # (B_pad, 2E)
    x2 = prep(jnp.concatenate([e2, e2_o], axis=1))   # (B_pad, 2E)
    xs = jnp.concatenate(
        [x1.reshape(n_blocks, bb, 2 * E), x2.reshape(n_blocks, bb, 2 * E)],
        axis=1).reshape(n_blocks * 2 * bb, 2 * E)

    w_pre_c = w_pre.astype(compute_dtype)
    w_post_c = w_post.astype(compute_dtype)

    esize = jnp.dtype(compute_dtype).itemsize
    cost = pl.CostEstimate(
        flops=2 * (2 * B_pad) * (2 * E) * M + 2 * B_pad * M * E,
        transcendentals=B_pad * E,                      # sigmoid
        bytes_accessed=(xs.size + w_pre_c.size + w_post_c.size) * esize
                       + B_pad * E * 4)

    out = pl.pallas_call(
        _inductive_offset_kernel,
        out_shape=jax.ShapeDtypeStruct((B_pad, E), jnp.float32),
        grid_spec=pltpu.PrefetchScalarGridSpec(
            num_scalar_prefetch=0,
            grid=(n_blocks,),
            in_specs=[
                pl.BlockSpec((2 * bb, 2 * E), lambda i: (i, 0)),   # stacked branches
                pl.BlockSpec((2 * E, M), lambda i: (0, 0)),        # W_pre (resident)
                pl.BlockSpec((M, E), lambda i: (0, 0)),            # W_post (resident)
            ],
            out_specs=pl.BlockSpec((bb, E), lambda i: (i, 0)),
        ),
        compiler_params=pltpu.CompilerParams(
            dimension_semantics=("parallel",)),
        cost_estimate=cost,
    )(xs, w_pre_c, w_post_c)

    return out[:B]


def _xavier_uniform(key, shape):
    fan_in, fan_out = shape[0], shape[1]
    bound = jnp.sqrt(6.0 / (fan_in + fan_out))
    return jax.random.uniform(key, shape, jnp.float32, -bound, bound)


def _reference(e1, e1_o, e2, e2_o, w_pre, w_post):
    t1 = jax.nn.relu(jnp.concatenate([e1, e1_o], axis=1) @ w_pre)
    t2 = jax.nn.relu(jnp.concatenate([e2, e2_o], axis=1) @ w_pre)
    combined = jnp.minimum(t1, t2)
    gate = jax.nn.sigmoid(combined @ w_post)
    offset_min = jnp.minimum(e1_o, e2_o)
    return offset_min * gate


def _round_bf16(a):
    return a.astype(jnp.bfloat16).astype(jnp.float32)


if __name__ == "__main__":
    # Small shapes consistent with the module: expand_dims = embedding width,
    # mode_dims = hidden width of the OffsetSet MLP.
    B = 16            # batch
    expand_dims = 32  # embedding dim
    mode_dims = 64    # hidden dim

    key = jax.random.PRNGKey(0)
    k1, k2, k3, k4, kw1, kw2 = jax.random.split(key, 6)

    e1 = jax.random.normal(k1, (B, expand_dims), jnp.float32)
    e1_o = jax.random.normal(k2, (B, expand_dims), jnp.float32)
    e2 = jax.random.normal(k3, (B, expand_dims), jnp.float32)
    e2_o = jax.random.normal(k4, (B, expand_dims), jnp.float32)

    # Deterministic xavier-uniform-style parameter init (no checkpoint load).
    w_pre = _xavier_uniform(kw1, (expand_dims * 2, mode_dims))
    w_post = _xavier_uniform(kw2, (mode_dims, expand_dims))

    ref_f32 = _reference(e1, e1_o, e2, e2_o, w_pre, w_post)
    ref_bf16 = _reference(*map(_round_bf16, (e1, e1_o, e2, e2_o, w_pre, w_post)))

    # Default bf16 fast path (halved HBM bytes, f32 accumulation).
    out_bf16 = jax.block_until_ready(
        inductive_offset_set(e1, e1_o, e2, e2_o, w_pre, w_post))
    assert out_bf16.shape == (B, expand_dims)
    assert jnp.allclose(out_bf16, ref_bf16, atol=2e-2, rtol=2e-2)

    # f32 path: tight check of the fused-kernel math itself.
    out_f32 = jax.block_until_ready(
        inductive_offset_set(e1, e1_o, e2, e2_o, w_pre, w_post,
                             compute_dtype=jnp.float32))
    assert jnp.allclose(out_f32, ref_f32, atol=1e-3, rtol=1e-3)

    print("KERNEL_OK")
</pallas_src>

<mosaic_0001>
module attributes {stable_mosaic.version = 11 : i64} {
  func.func @_inductive_offset_kernel(%arg0: i32, %arg1: memref<32x64xbf16, #tpu.memory_space<vmem>>, %arg2: memref<64x64xbf16, #tpu.memory_space<vmem>>, %arg3: memref<64x32xbf16, #tpu.memory_space<vmem>>, %arg4: memref<16x32xf32, #tpu.memory_space<vmem>>) attributes {dimension_semantics = [#tpu.dimension_semantics<parallel>], iteration_bounds = array<i64: 1>, scalar_prefetch = 0 : i64, scratch_operands = 0 : i64, tpu.core_type = #tpu.core_type<tc>, window_params = [{transform_indices = @transform_0, window_bounds = array<i64: 32, 64>}, {pipeline_mode = #tpu.pipeline_mode<synchronous>, transform_indices = @transform_1, window_bounds = array<i64: 64, 64>}, {pipeline_mode = #tpu.pipeline_mode<synchronous>, transform_indices = @transform_2, window_bounds = array<i64: 64, 32>}, {transform_indices = @transform_3, window_bounds = array<i64: 16, 32>}]} {
    %c0 = arith.constant 0 : index
    %c0_0 = arith.constant 0 : index
    %0 = vector.load %arg1[%c0, %c0_0] : memref<32x64xbf16, #tpu.memory_space<vmem>>, vector<32x64xbf16>
    %c0_1 = arith.constant 0 : index
    %c0_2 = arith.constant 0 : index
    %1 = vector.load %arg2[%c0_1, %c0_2] : memref<64x64xbf16, #tpu.memory_space<vmem>>, vector<64x64xbf16>
    %c0_3 = arith.constant 0 : index
    %c0_4 = arith.constant 0 : index
    %2 = vector.load %arg3[%c0_3, %c0_4] : memref<64x32xbf16, #tpu.memory_space<vmem>>, vector<64x32xbf16>
    %cst = arith.constant dense<0.000000e+00> : vector<32x64xf32>
    %3 = tpu.matmul %0, %1, %cst {dimension_numbers = #tpu.dot_dimension_numbers<[1], [0], [0], [1], [0, 0, 1, 1], [], []>} : vector<32x64xbf16>, vector<64x64xbf16>, vector<32x64xf32> -> vector<32x64xf32>
    %cst_5 = arith.constant 0.000000e+00 : f32
    %4 = vector.broadcast %cst_5 : f32 to vector<32x64xf32>
    %5 = arith.maximumf %3, %4 : vector<32x64xf32>
    %6 = vector.extract_strided_slice %5 {offsets = [0, 0], sizes = [16, 64], strides = [1, 1]} : vector<32x64xf32> to vector<16x64xf32>
    %7 = vector.extract_strided_slice %5 {offsets = [16, 0], sizes = [16, 64], strides = [1, 1]} : vector<32x64xf32> to vector<16x64xf32>
    %8 = arith.minimumf %6, %7 : vector<16x64xf32>
    %9 = arith.truncf %8 : vector<16x64xf32> to vector<16x64xbf16>
    %cst_6 = arith.constant dense<0.000000e+00> : vector<16x32xf32>
    %10 = tpu.matmul %9, %2, %cst_6 {dimension_numbers = #tpu.dot_dimension_numbers<[1], [0], [0], [1], [0, 0, 1, 1], [], []>} : vector<16x64xbf16>, vector<64x32xbf16>, vector<16x32xf32> -> vector<16x32xf32>
    %11 = arith.negf %10 : vector<16x32xf32>
    %12 = math.exp %11 : vector<16x32xf32>
    %cst_7 = arith.constant 1.000000e+00 : f32
    %13 = vector.broadcast %cst_7 : f32 to vector<16x32xf32>
    %14 = arith.addf %13, %12 : vector<16x32xf32>
    %15 = arith.divf %13, %14 : vector<16x32xf32>
    %16 = vector.extract_strided_slice %0 {offsets = [0, 32], sizes = [16, 32], strides = [1, 1]} : vector<32x64xbf16> to vector<16x32xbf16>
    %17 = arith.extf %16 : vector<16x32xbf16> to vector<16x32xf32>
    %18 = vector.extract_strided_slice %0 {offsets = [16, 32], sizes = [16, 32], strides = [1, 1]} : vector<32x64xbf16> to vector<16x32xbf16>
    %19 = arith.extf %18 : vector<16x32xbf16> to vector<16x32xf32>
    %20 = arith.minimumf %17, %19 : vector<16x32xf32>
    %21 = arith.mulf %20, %15 : vector<16x32xf32>
    %c0_8 = arith.constant 0 : index
    %c0_9 = arith.constant 0 : index
    %22 = vector.load %arg4[%c0_8, %c0_9] : memref<16x32xf32, #tpu.memory_space<vmem>>, vector<16x32xf32>
    tpu.vector_store %arg4[%c0_8, %c0_9], %21 {strides = array<i32>} : memref<16x32xf32, #tpu.memory_space<vmem>>, vector<16x32xf32>,
    return
  }
  func.func @transform_0(%arg0: i32) -> (i32, i32) {
    %c0_i32 = arith.constant 0 : i32
    %c0_i32_0 = arith.constant 0 : i32
    return %arg0, %c0_i32 : i32, i32
  }
  func.func @transform_1(%arg0: i32) -> (i32, i32) {
    %c0_i32 = arith.constant 0 : i32
    %c0_i32_0 = arith.constant 0 : i32
    %c0_i32_1 = arith.constant 0 : i32
    return %c0_i32, %c0_i32_0 : i32, i32
  }
  func.func @transform_2(%arg0: i32) -> (i32, i32) {
    %c0_i32 = arith.constant 0 : i32
    %c0_i32_0 = arith.constant 0 : i32
    %c0_i32_1 = arith.constant 0 : i32
    return %c0_i32, %c0_i32_0 : i32, i32
  }
  func.func @transform_3(%arg0: i32) -> (i32, i32) {
    %c0_i32 = arith.constant 0 : i32
    %c0_i32_0 = arith.constant 0 : i32
    return %arg0, %c0_i32 : i32, i32
  }
}

</mosaic_0001>

<bundles_post_ra>
// kernel: tpu_custom_call.1
= control target key start
LH: loop header
LB: loop body
LE: loop exit
PB: predicated region body
PF: predicated region fallthrough
CT: control target
= control target key end

     0   :  { %v357_v2 = vmov 0.0   ;;  %vm70_vm0 = vcmask 523264   ;;  %s434_s0 = inlined_call_operand.vmem [shape: bf16[32,64], index: 0, kind: input, shape index: {}]   ;;  %s435_s1 = inlined_call_operand.vmem [shape: bf16[64,64], index: 1, kind: input, shape index: {}]   ;;  %s436_s2 = inlined_call_operand.vmem [shape: bf16[64,32], index: 2, kind: input, shape index: {}]   ;;  %s437_s3 = inlined_call_operand.hbm [shape: f32[16,32], index: 3, kind: output, shape index: {}]  }
   0x1   :  { %v313_v0 = vld [vmem:[%s435_s1] sm:$0xff]   ;;  %v314_v1 = vld [vmem:[%s435_s1 + $0x8] sm:$0xff]   ;;  %294 = vmatprep.subr.bf16.mxu1 %v357_v2  ;;  %v315_v3 = vld [vmem:[%s435_s1 + $0x10] sm:$0xff]  }
   0x2   :  { %282 = vmatprep.subr.bf16.mxu0 %v313_v0  ;;  %v396_v4 = vld [vmem:[%s434_s0] sm:$0xff]   ;;  %v316_v6 = vld [vmem:[%s435_s1 + $0x18] sm:$0xff]   ;;  %v320_v7 = vld [vmem:[%s436_s2 + $0x8] sm:$0xff]  }
   0x3   :  { %283 = vmatpush3.bf16.msra.mxu0 %v313_v0  ;;  %v319_v5 = vld [vmem:[%s436_s2] sm:$0xff]   ;;  %290 = vmatprep.mubr.msk.bf16.mxu0 %vm70_vm0, %v396_v4 }
   0x4   :  { %284 = vmatprep.subr.bf16.mxu0 %v314_v1  ;;  %295 = vmatpush3.bf16.msra.mxu1 %v319_v5 }
   0x7   :  { %285 = vmatpush3.bf16.msra.mxu0 %v314_v1 }
   0x8   :  { %286 = vmatprep.subr.bf16.mxu0 %v315_v3 }
   0x9   :  { %8 = vsyncpa [#allocation3], 0  ;;  %296 = vmatprep.subr.bf16.mxu1 %v357_v2  ;;  %v18_v8 = vld [vmem:[%s434_s0 + $0x8] sm:$0xff]   ;;  %v321_v9 = vld [vmem:[%s436_s2 + $0x10] sm:$0xff]   ;;  %vm358_vm1 = vmmov 0   ;;  %s359_s0 = smov 32   ;;  %v213_v34 = vunpack.c.l.bf16 %v396_v4  ;;  %v214_v36 = vunpack.c.h.bf16 %v396_v4 }
   0xa   :  { %297 = vmatpush3.bf16.msra.mxu1 %v320_v7  ;;  %v322_v10 = vld [vmem:[%s436_s2 + $0x18] sm:$0xff]   ;;  %302 = vmatprep.mubr.msk.bf16.mxu1 %vm358_vm1, %v357_v2  ;;  %v215_v35 = vunpack.c.l.bf16 %v18_v8  ;;  %v216_v38 = vunpack.c.h.bf16 %v18_v8  ;;  %s360_s2 = smov 96   ;;  %vm237_vm2 = vcmask 261120   ;;  %s361_s4 = smov [#allocation2]  }
   0xb   :  { %287 = vmatpush3.bf16.msra.mxu0 %v315_v3  ;;  %298 = vmatprep.subr.bf16.mxu1 %v357_v2  ;;  %s245_s5 = sshll.u32 %s361_s4, 4  ;;  %s246_s5 = int_to_ptr.vmem [resolvable:$true] %s245_s5 }
   0xc   :  { %288 = vmatprep.subr.bf16.mxu0 %v316_v6  ;;  %v217_v37 = vmin.f32 %v213_v34, %v215_v35  ;;  %v218_v41 = vmin.f32 %v214_v36, %v216_v38  ;;  %s333_s6 = scalar_lea.vmem %s246_s5, 256  ;;  %p338_p1 = scmp.lt.s32.totalorder %s246_s5, %s246_s5 }
   0xd   :  { %p334_p0 = scmp.ne.s32.totalorder %s246_s5, %s333_s6  ;;  %p339_p2 = scmp.lt.s32.totalorder %s333_s6, %s333_s6 }
   0xe   :  { %299 = vmatpush3.bf16.msra.mxu1 %v321_v9 }
   0xf   :  { %289 = vmatpush3.bf16.msra.mxu0 %v316_v6  ;;  %300 = vmatprep.subr.bf16.mxu1 %v357_v2  ;;  %p340_p3 = por %p339_p2, %p338_p1 }
  0x11   :  { %p341_p4 = pnand %p340_p3, %p334_p0 }
  0x12   :  { %291 = vmatmul.mubr.msk.bf16.vlgmr.msra.gmra.mrb[0].mxu0 %vm70_vm0, %v18_v8  ;;  %301 = vmatpush3.bf16.msra.mxu1 %v322_v10 }
  0xe5   :  { %v292_v11 = vpop.f32.mrb[0].mxu0 }
  0xe6   :  { %v128_v12 = vmax.f32 %v292_v11, 0.0  ;;  %v111_v13 = vpop.f32.mrb[1].mxu0 }
  0xe7   :  { %v126_v14 = vmax.f32 %v111_v13, 0.0  ;;  %v293_v15 = vpop.f32.mrb[2].mxu0 }
  0xe8   :  { %v129_v16 = vmax.f32 %v293_v15, 0.0  ;;  %v114_v17 = vpop.f32.mrb[3].mxu0 }
  0xe9   :  { %v130_v18 = vmin.f32 %v126_v14, %v128_v12  ;;  %v127_v19 = vmax.f32 %v114_v17, 0.0 }
  0xeb   :  { %v131_v20 = vmin.f32 %v127_v19, %v129_v16 }
  0xed   :  { %v132_v21 = vpack.c.bf16 %v131_v20, %v130_v18 }
  0xef   :  { %303 = vmatmul.mubr.msk.bf16.vlgmr.msra.gmra.mrb[0].mxu1 %vm70_vm0, %v132_v21 }
 0x1c2   :  { %v194_v22 = vpop.f32.mrb[0].mxu1 }
 0x1c3   :  { %v269_v23 = vmul.f32 -1.442695, %v194_v22  ;;  %v304_v24 = vpop.f32.mrb[1].mxu1 }
 0x1c4   :  { %v197_v25 = vpop.f32.mrb[2].mxu1 }
 0x1c5   :  { %325 = vpow2.f32 %v269_v23  ;;  %v270_v26 = vmul.f32 -1.442695, %v197_v25  ;;  %v305_v27 = vpop.f32.mrb[3].mxu1 }
 0x1c7   :  { %327 = vpow2.f32 %v270_v26 }
 0x1cf   :  { %v326_v28 = vpop.eup %325 }
 0x1d0   :  { %v207_v29 = vadd.f32 1.0, %v326_v28 }
 0x1d1   :  { %v328_v30 = vpop.eup %327 }
 0x1d2   :  { %329 = vrcp.f32 %v207_v29  ;;  %v208_v31 = vadd.f32 1.0, %v328_v30 }
 0x1d4   :  { %331 = vrcp.f32 %v208_v31 }
 0x1dc   :  { %v330_v32 = vpop.eup %329 }
 0x1dd   :  { %221 = vrot.lane.b32.xlu0 %v330_v32, %s359_s0 }
 0x1de   :  { %v332_v33 = vpop.eup %331 }
 0x1e1   :  { %223 = vrot.lane.b32.xlu0 %v332_v33, %s359_s0 }
 0x24f   :  { %v222_v39 = vpop.permute.xlu0 %221 }
 0x250   :  { %v227_v40 = vmul.f32 %v222_v39, %v217_v37 }
 0x252   :  { %231 = vrot.lane.b32.xlu1 %v227_v40, %s360_s2 }
 0x253   :  { %v224_v42 = vpop.permute.xlu0 %223 }
 0x254   :  { %v228_v43 = vmul.f32 %v224_v42, %v218_v41 }
 0x256   :  { %233 = vrot.lane.b32.xlu1 %v228_v43, %s360_s2 }
 0x2c4   :  { %v232_v44 = vpop.permute.xlu1 %231 }
 0x2c5   :  { %238 = vst.msk [vmem:[#allocation2] sm:$0xff] %vm237_vm2, %v232_v44 }
 0x2c8   :  { %v234_v45 = vpop.permute.xlu1 %233 }
 0x2c9   :  { %239 = vst.msk [vmem:[#allocation2 + $0x8] sm:$0xff] %vm237_vm2, %v234_v45 }
 0x2ca   :  { %344 = shalt.err (!%p341_p4)
}
 0x2cb   :  { %s345_s9 = scalar_lea.hbm %s437_s3, 256 }
 0x2cc   :  { %p346_p5 = scmp.ne.s32.totalorder %s437_s3, %s345_s9  ;;  %p349_p6 = scmp.lt.u32.totalorder %s345_s9, %s437_s3 }
 0x2ce   :  { %p351_p7 = pnand %p349_p6, %p346_p5 }
 0x2d0   :  { %354 = shalt.err (!%p351_p7)
}
 0x2d1   :  { %s362_s14 = smov 128   ;;  %s363_s15 = smov 8  }
 0x2d2   :  { %251 = dma.vmem_to_hbm [thread:$0]  %s246_s5, 256, %s437_s3, [#allocation3], %s362_s14, %s362_s14, %s363_s15  }
 0x2d3   :  { %355 = dma.done.wait [#allocation3], 256  }
 0x2d4   :  { %356 = vsyncadd [#allocation3], 4294967040 }
 0x2d5   :  { %255 = vsyncpa [#allocation3], 1 }

</bundles_post_ra>
